<compile_context>
chip_gen: v5e
topology: v5e:2x2
jax: 0.10.0
libtpu: 0.0.40
codegen_flags: <defaults>
</compile_context>

<pallas_src>
import jax
import jax.numpy as jnp
from jax.experimental import pallas as pl
from jax.experimental.pallas import tpu as pltpu

_LANE = 128
_TARGET_BLOCK_BYTES = 2 << 20  # ~2 MiB of (lane-padded) input per tensor per block


def _round_up(x, m):
    return ((x + m - 1) // m) * m


def _vmem_limit_bytes():
    """Generation-aware scoped-VMEM limit with headroom."""
    cap = 64 << 20
    try:
        cap = int(getattr(pltpu.get_tpu_info(), "vmem_capacity_bytes", cap))
    except Exception:
        pass
    # 128 MiB parts (v5e/v6e) -> 96 MiB; 64 MiB parts (v7x) -> 40 MiB.
    return (96 << 20) if cap >= (100 << 20) else (40 << 20)


def _pick_batch_tile(B, D, itemsize, min_blocks=4):
    """Batch tile sized from a per-block byte target using the lane-padded
    feature dim; multiples of 128 so the lane-dense (2, TB) output block is
    legal. Guarantees >= min_blocks grid steps for batches big enough to
    split (>= 2 steps per TensorCore on dual-core parts)."""
    row_bytes = _round_up(D, _LANE) * itemsize
    tb = max(_LANE, (_TARGET_BLOCK_BYTES // row_bytes) // _LANE * _LANE)
    if B >= min_blocks * _LANE:
        tb = min(tb, _round_up(pl.cdiv(B, min_blocks), _LANE))
    if B <= tb:
        # Single block covering the whole (possibly unaligned) batch; block
        # shape equal to the full array dim is always legal.
        return B
    return tb


def _regression_head_kernel(bias_ref, loc_ref, scale_ref, w_ref, out_ref):
    # loc_ref/scale_ref: [TB, D] in VMEM; w_ref: [2, D] f32 (row 0 = W,
    # row 1 = |W|); bias_ref: [1] f32 in SMEM.
    # out_ref: [2, TB] -> row 0 = value_loc, row 1 = value_scale (lane-dense).
    loc = loc_ref[...].astype(jnp.float32)      # [TB, D]
    scale = scale_ref[...].astype(jnp.float32)  # [TB, D]
    w = w_ref[0:1, :]                           # [1, D] (already f32)
    aw = w_ref[1:2, :]                          # [1, D] == |W|
    b = bias_ref[0]

    # Reduction over causal_dim (lane axis) on the VPU; f32 accumulation.
    vloc = jnp.sum(loc * w, axis=-1, keepdims=True) + b           # [TB, 1]
    vscale = jnp.sum(scale * aw, axis=-1, keepdims=True)          # [TB, 1]

    packed = jnp.concatenate([vloc, vscale], axis=-1)             # [TB, 2]
    # Sublane->lane relayout (XLU) so the store is one wide, unmasked block.
    out_ref[...] = packed.T.astype(out_ref.dtype)                 # [2, TB]


def regression_head_forward(causal_loc, causal_scale, weight, bias,
                            batch_tile=None):
    """causal_loc, causal_scale: [B, D]; weight: [1, D]; bias: [1].

    Returns (value_loc, value_scale), each of shape [B]."""
    B, D = causal_loc.shape
    assert causal_scale.shape == (B, D)
    assert weight.shape == (1, D)
    assert bias.shape == (1,)

    itemsize = max(jnp.dtype(causal_loc.dtype).itemsize,
                   jnp.dtype(causal_scale.dtype).itemsize)
    if batch_tile is None:
        TB = _pick_batch_tile(B, D, itemsize)
    else:
        TB = B if batch_tile >= B else batch_tile
    if TB < B:
        assert TB % _LANE == 0, (
            "batch_tile must be a multiple of 128 when tiling (lane-dense "
            "output block)")

    grid = (pl.cdiv(B, TB),)
    out_dtype = jnp.promote_types(causal_loc.dtype, causal_scale.dtype)

    # Precompute [W ; |W|] once (f32) so the kernel does no per-step abs/cast
    # of the weights.
    w_stack = jnp.concatenate([weight, jnp.abs(weight)], axis=0).astype(jnp.float32)
    bias_f32 = bias.astype(jnp.float32)

    packed = pl.pallas_call(
        _regression_head_kernel,
        out_shape=jax.ShapeDtypeStruct((2, B), out_dtype),
        grid_spec=pltpu.PrefetchScalarGridSpec(
            num_scalar_prefetch=0,
            grid=grid,
            in_specs=[
                pl.BlockSpec(memory_space=pltpu.MemorySpace.SMEM),  # bias
                pl.BlockSpec((TB, D), lambda i: (i, 0)),            # causal_loc
                pl.BlockSpec((TB, D), lambda i: (i, 0)),            # causal_scale
                pl.BlockSpec((2, D), lambda i: (0, 0)),             # [W ; |W|]
            ],
            out_specs=pl.BlockSpec((2, TB), lambda i: (0, i)),      # lane-dense
        ),
        compiler_params=pltpu.CompilerParams(
            dimension_semantics=("parallel",),   # batch tiles are independent
            vmem_limit_bytes=_vmem_limit_bytes(),
        ),
    )(bias_f32, causal_loc, causal_scale, w_stack)

    # squeeze(-1) as in the PyTorch forward: row 0 = value_loc, row 1 = scale.
    return packed[0], packed[1]


def _reference(causal_loc, causal_scale, weight, bias):
    loc = causal_loc.astype(jnp.float32)
    scale = causal_scale.astype(jnp.float32)
    w = weight.astype(jnp.float32)
    ref_loc = loc @ w.T + bias.astype(jnp.float32)     # [B, 1]
    ref_scale = scale @ jnp.abs(w).T                   # [B, 1]
    return ref_loc[:, 0], ref_scale[:, 0]


if __name__ == "__main__":
    D = 32  # causal_dim
    key = jax.random.PRNGKey(0)
    k_loc, k_scale, k_w, k_b = jax.random.split(key, 4)

    # Deterministic parameters (nn.Linear-like uniform bounds)
    bound = 1.0 / (D ** 0.5)
    weight = jax.random.uniform(k_w, (1, D), minval=-bound, maxval=bound,
                                dtype=jnp.float32)
    bias = jax.random.uniform(k_b, (1,), minval=-bound, maxval=bound,
                              dtype=jnp.float32)

    # --- Test 1: tiny batch (B=2), single full-array block ---------------
    B = 2
    causal_loc = jax.random.normal(k_loc, (B, D), dtype=jnp.float32)
    causal_scale = jax.nn.softplus(
        jax.random.normal(k_scale, (B, D), dtype=jnp.float32))

    value_loc, value_scale = regression_head_forward(
        causal_loc, causal_scale, weight, bias)
    jax.block_until_ready((value_loc, value_scale))

    ref_loc, ref_scale = _reference(causal_loc, causal_scale, weight, bias)
    assert value_loc.shape == (B,) and value_scale.shape == (B,)
    assert jnp.allclose(value_loc, ref_loc, atol=1e-5)
    assert jnp.allclose(value_scale, ref_scale, atol=1e-5)

    # --- Test 2: batch tiling with a ragged last block (B=300, TB=128) ---
    B2 = 300
    loc2 = jax.random.normal(k_loc, (B2, D), dtype=jnp.float32)
    scale2 = jax.nn.softplus(jax.random.normal(k_scale, (B2, D),
                                               dtype=jnp.float32))
    vloc2, vscale2 = regression_head_forward(loc2, scale2, weight, bias,
                                             batch_tile=128)
    jax.block_until_ready((vloc2, vscale2))
    rloc2, rscale2 = _reference(loc2, scale2, weight, bias)
    assert vloc2.shape == (B2,) and vscale2.shape == (B2,)
    assert jnp.allclose(vloc2, rloc2, atol=1e-5)
    assert jnp.allclose(vscale2, rscale2, atol=1e-5)

    # --- Test 3: bf16 activations, f32 accumulation inside the kernel ----
    loc_bf = loc2.astype(jnp.bfloat16)
    scale_bf = scale2.astype(jnp.bfloat16)
    vloc_bf, vscale_bf = regression_head_forward(loc_bf, scale_bf, weight, bias,
                                                 batch_tile=128)
    jax.block_until_ready((vloc_bf, vscale_bf))
    rloc_bf, rscale_bf = _reference(loc_bf, scale_bf, weight, bias)
    assert jnp.allclose(vloc_bf.astype(jnp.float32), rloc_bf, atol=5e-2)
    assert jnp.allclose(vscale_bf.astype(jnp.float32), rscale_bf, atol=5e-2)

    print("KERNEL_OK")
</pallas_src>

<mosaic_0001>
module attributes {stable_mosaic.version = 11 : i64} {
  func.func @_regression_head_kernel(%arg0: i32, %arg1: memref<1xf32, #tpu.memory_space<smem>>, %arg2: memref<2x32xf32, #tpu.memory_space<vmem>>, %arg3: memref<2x32xf32, #tpu.memory_space<vmem>>, %arg4: memref<2x32xf32, #tpu.memory_space<vmem>>, %arg5: memref<2x2xf32, #tpu.memory_space<vmem>>) attributes {dimension_semantics = [#tpu.dimension_semantics<parallel>], iteration_bounds = array<i64: 1>, scalar_prefetch = 0 : i64, scratch_operands = 0 : i64, tpu.core_type = #tpu.core_type<tc>, window_params = [{transform_indices = @transform_0, window_bounds = array<i64: 1>}, {transform_indices = @transform_1, window_bounds = array<i64: 2, 32>}, {transform_indices = @transform_2, window_bounds = array<i64: 2, 32>}, {pipeline_mode = #tpu.pipeline_mode<synchronous>, transform_indices = @transform_3, window_bounds = array<i64: 2, 32>}, {transform_indices = @transform_4, window_bounds = array<i64: 2, 2>}]} {
    %c0 = arith.constant 0 : index
    %c0_0 = arith.constant 0 : index
    %0 = vector.load %arg2[%c0, %c0_0] : memref<2x32xf32, #tpu.memory_space<vmem>>, vector<2x32xf32>
    %c0_1 = arith.constant 0 : index
    %c0_2 = arith.constant 0 : index
    %1 = vector.load %arg3[%c0_1, %c0_2] : memref<2x32xf32, #tpu.memory_space<vmem>>, vector<2x32xf32>
    %c0_3 = arith.constant 0 : index
    %c0_4 = arith.constant 0 : index
    %2 = vector.load %arg4[%c0_3, %c0_4] : memref<2x32xf32, #tpu.memory_space<vmem>>, vector<1x32xf32>
    %c1 = arith.constant 1 : index
    %c0_5 = arith.constant 0 : index
    %3 = vector.load %arg4[%c1, %c0_5] : memref<2x32xf32, #tpu.memory_space<vmem>>, vector<1x32xf32>
    %c0_6 = arith.constant 0 : index
    %4 = memref.load %arg1[%c0_6] : memref<1xf32, #tpu.memory_space<smem>>
    %5 = vector.broadcast %2 : vector<1x32xf32> to vector<2x32xf32>
    %6 = arith.mulf %0, %5 : vector<2x32xf32>
    %cst = arith.constant dense<0.000000e+00> : vector<2xf32>
    %7 = vector.multi_reduction <add>, %6, %cst [1] : vector<2x32xf32> to vector<2xf32>
    %8 = vector.shape_cast %7 : vector<2xf32> to vector<2x1xf32>
    %9 = vector.broadcast %4 : f32 to vector<2x1xf32>
    %10 = arith.addf %8, %9 : vector<2x1xf32>
    %11 = vector.broadcast %3 : vector<1x32xf32> to vector<2x32xf32>
    %12 = arith.mulf %1, %11 : vector<2x32xf32>
    %cst_7 = arith.constant dense<0.000000e+00> : vector<2xf32>
    %13 = vector.multi_reduction <add>, %12, %cst_7 [1] : vector<2x32xf32> to vector<2xf32>
    %14 = vector.shape_cast %13 : vector<2xf32> to vector<2x1xf32>
    %15 = tpu.concatenate %10, %14 in 1 : vector<2x1xf32>, vector<2x1xf32> -> vector<2x2xf32>
    %16 = tpu.transpose %15, [1, 0] : vector<2x2xf32> -> vector<2x2xf32>
    %c0_8 = arith.constant 0 : index
    %c0_9 = arith.constant 0 : index
    %17 = vector.load %arg5[%c0_8, %c0_9] : memref<2x2xf32, #tpu.memory_space<vmem>>, vector<2x2xf32>
    tpu.vector_store %arg5[%c0_8, %c0_9], %16 {strides = array<i32>} : memref<2x2xf32, #tpu.memory_space<vmem>>, vector<2x2xf32>,
    return
  }
  func.func @transform_0(%arg0: i32) -> i32 {
    %c0_i32 = arith.constant 0 : i32
    %c0_i32_0 = arith.constant 0 : i32
    return %c0_i32 : i32
  }
  func.func @transform_1(%arg0: i32) -> (i32, i32) {
    %c0_i32 = arith.constant 0 : i32
    %c0_i32_0 = arith.constant 0 : i32
    return %arg0, %c0_i32 : i32, i32
  }
  func.func @transform_2(%arg0: i32) -> (i32, i32) {
    %c0_i32 = arith.constant 0 : i32
    %c0_i32_0 = arith.constant 0 : i32
    return %arg0, %c0_i32 : i32, i32
  }
  func.func @transform_3(%arg0: i32) -> (i32, i32) {
    %c0_i32 = arith.constant 0 : i32
    %c0_i32_0 = arith.constant 0 : i32
    %c0_i32_1 = arith.constant 0 : i32
    return %c0_i32, %c0_i32_0 : i32, i32
  }
  func.func @transform_4(%arg0: i32) -> (i32, i32) {
    %c0_i32 = arith.constant 0 : i32
    %c0_i32_0 = arith.constant 0 : i32
    return %c0_i32, %arg0 : i32, i32
  }
}

</mosaic_0001>

<bundles_post_ra>
// kernel: tpu_custom_call.1
= control target key start
LH: loop header
LB: loop body
LE: loop exit
PB: predicated region body
PF: predicated region fallthrough
CT: control target
= control target key end

     0   :  { %10 = vsyncpa [#allocation4], 0  ;;  %s246_s0 = inlined_call_operand.<no memory space> [shape: f32[1], index: 0, kind: input, shape index: {}]   ;;  %s247_s1 = inlined_call_operand.vmem [shape: f32[2,32], index: 1, kind: input, shape index: {}]   ;;  %s248_s2 = inlined_call_operand.hbm [shape: f32[2,32], index: 2, kind: input, shape index: {}]   ;;  %s249_s3 = inlined_call_operand.hbm [shape: f32[2,32], index: 3, kind: input, shape index: {}]   ;;  %s250_s4 = inlined_call_operand.hbm [shape: f32[2,2], index: 4, kind: output, shape index: {}]  }
   0x1   :  { %11 = vsyncpa [#allocation7], 0 }
   0x2   :  { %12 = vsyncpa [#allocation5], 0  ;;  %s22_s17 = sshll.u32 %s248_s2, 4  ;;  %s203_s18 = smov [#allocation3]   ;;  %s23_s17 = int_to_ptr.hbm [resolvable:$true] %s22_s17 }
   0x3   :  { %s24_s19 = sshll.u32 %s203_s18, 4  ;;  %s33_s22 = sshll.u32 %s249_s3, 4  ;;  %s25_s19 = int_to_ptr.vmem [resolvable:$true] %s24_s19  ;;  %s34_s22 = int_to_ptr.hbm [resolvable:$true] %s33_s22 }
   0x4   :  { %27 = dma.hbm_to_vmem [thread:$0]  %s23_s17, 32, %s25_s19, [#allocation4]  }
   0x5   :  { %s204_s23 = smov [#allocation6]  }
   0x6   :  { %s35_s24 = sshll.u32 %s204_s23, 4  ;;  %s36_s24 = int_to_ptr.vmem [resolvable:$true] %s35_s24 }
   0x7   :  { %38 = dma.hbm_to_vmem [thread:$0]  %s34_s22, 32, %s36_s24, [#allocation7]  }
   0x8   :  { %197 = dma.done.wait [#allocation4], 32  }
   0x9   :  { %198 = vsyncadd [#allocation4], 4294967264 }
   0xa   :  { %199 = dma.done.wait [#allocation7], 32  }
   0xb   :  { %200 = vsyncadd [#allocation7], 4294967264  ;;  %v47_v0 = vld [vmem:[%s247_s1] sm:$0x3]  ;;  %v123_v1 = vld [vmem:[#allocation6] ss:$0 sm:$0xff]  ;;  %v58_v9 = vstv %s246_s0 }
   0xc   :  { %vm54_vm0 = vcmask 254976   ;;  %v53_v2 = vmul.f32 %v123_v1, %v47_v0  ;;  %v124_v3 = vld [vmem:[#allocation6 + $0x1] ss:$0 sm:$0xff]  ;;  %v48_v4 = vld [vmem:[#allocation3] sm:$0x3]  ;;  %vm65_vm1 = vcmask 7168  }
   0xd   :  { %v61_v6 = vmul.f32 %v124_v3, %v48_v4  ;;  %s205_s1 = smov [#allocation8]   ;;  %s108_s30 = sshll.u32 %s250_s4, 4  ;;  %vm99_vm2 = vcmask 9216   ;;  %s109_s30 = int_to_ptr.hbm [resolvable:$true] %s108_s30 }
   0xe   :  { %v55_v5 = vsel %vm54_vm0, %v53_v2, 0.0  ;;  %s106_s27 = sshll.u32 %s205_s1, 4  ;;  %s107_s27 = int_to_ptr.vmem [resolvable:$true] %s106_s27 }
   0xf   :  { %56 = vadd.xlane.f32.xlu0 %v55_v5  ;;  %v62_v7 = vsel %vm54_vm0, %v61_v6, 0.0 }
  0x17   :  { %63 = vadd.xlane.f32.xlu0 %v62_v7 }
  0x82   :  { %v57_v8 = vpop.xlane.xlu0 %56 }
  0x83   :  { %v59_v10 = vadd.f32 %v58_v9, %v57_v8 }
  0x8a   :  { %v64_v11 = vpop.xlane.xlu0 %63 }
  0x8b   :  { %v66_v12 = vsel %vm65_vm1, %v59_v10, %v64_v11 }
  0x8c   :  { %67 = vxpose.xlu1.b32.start.end [1/1] (short) (narrow) %v66_v12, 8 }
 0x130   :  { %v83_v13 = vpop.trf.xlu1 }
 0x131   :  { %100 = vst.msk [vmem:[#allocation8] sm:$0x3] %vm99_vm2, %v83_v13 }
 0x132   :  { %111 = dma.vmem_to_hbm [thread:$0]  %s107_s27, 32, %s109_s30, [#allocation5]  }
 0x133   :  { %201 = dma.done.wait [#allocation5], 32  }
 0x134   :  { %202 = vsyncadd [#allocation5], 4294967264 }
 0x135   :  { %116 = vsyncpa [#allocation4], 1 }
 0x136   :  { %117 = vsyncpa [#allocation7], 1 }
 0x137   :  { %118 = vsyncpa [#allocation5], 1 }

</bundles_post_ra>
